<compile_context>
chip_gen: v7x
topology: tpu7x:2x2x1
jax: 0.10.0
libtpu: 0.0.40
codegen_flags: <defaults>
</compile_context>

<pallas_src>
import jax
import jax.numpy as jnp
from jax import lax
from jax.experimental import pallas as pl
from jax.experimental.pallas import tpu as pltpu


# ----------------------------------------------------------------------------
# Wrapper-side weight preparation (plain JAX, runs once per call under jit).
# ----------------------------------------------------------------------------
def _band_weights(w, W, pad_out):
    """Fold the kw taps of a 3x3 conv into banded (block-Toeplitz) matrices.

    w: (3, 3, Ci, Co).  Returns T of shape (3, (W+2)*Ci, Wout*Co) with
    Wout = W+2 if pad_out else W, such that for a width-padded input row
    xrow (shape ((W+2)*Ci,)), xrow @ T[kh] is the kh-tap partial conv for every
    output column (halo output columns already forced to zero if pad_out).
    """
    _, _, Ci, Co = w.shape
    Wout, off = (W + 2, 1) if pad_out else (W, 0)
    cols = jnp.arange(Wout)
    col_ok = ((cols >= off) & (cols < W + off)).astype(w.dtype)
    per_kh = []
    for kh in range(3):
        tk = jnp.zeros((W + 2, Ci, Wout, Co), w.dtype)
        for kw in range(3):
            band = jnp.eye(W + 2, Wout, k=off - kw, dtype=w.dtype) * col_ok
            tk = tk + jnp.einsum("pq,io->piqo", band, w[kh, kw])
        per_kh.append(tk)
    return jnp.stack(per_kh, 0).reshape(3, (W + 2) * Ci, Wout * Co)


def _bias_row(b, W, pad_out):
    """Width-tiled bias row matching the banded-matmul output layout."""
    Co = b.shape[0]
    Wout, off = (W + 2, 1) if pad_out else (W, 0)
    cols = jnp.arange(Wout)
    ok = ((cols >= off) & (cols < W + off)).astype(b.dtype)[:, None]
    return (ok * b[None, :]).reshape(1, Wout * Co)


def _pick_row_tile(H):
    # Largest 8-aligned row tile that divides H while still giving >= 2 row
    # tiles (so the halo path is exercised and small-N grids still have enough
    # parallel steps for v7x's two TensorCores).  Tune upward for big images.
    for th in (64, 32, 16, 8):
        if H % th == 0 and H // th >= 2:
            return th
    return H


# ----------------------------------------------------------------------------
# Fused DoubleConv kernel.
# ----------------------------------------------------------------------------
def _make_double_conv_kernel(H, W, TH, Cin, Cmid, Cout):
    R1 = TH + 2      # intermediate rows per tile (1-row halo for conv2)
    WP = W + 2       # padded width

    def kernel(x_ref, t1_ref, b1_ref, t2_ref, b2_ref, o_ref, hbuf):
        # x_ref: (TH+4, WP*Cin) halo slab, already pipelined into VMEM.
        i = pl.program_id(1)          # row tile

        # ---- conv1 + bias + ReLU: intermediate stays in VMEM ----------------
        # One matmul per kh tap; kw taps + channels folded into t1's band.
        acc = jnp.broadcast_to(b1_ref[...], (R1, WP * Cmid)).astype(jnp.float32)
        for kh in range(3):
            acc = acc + jnp.dot(x_ref[kh:kh + R1, :], t1_ref[kh],
                                preferred_element_type=jnp.float32)
        h = jnp.maximum(acc, 0.0)

        # Intermediate rows that fall outside the image are conv2's zero
        # padding (NOT conv1 applied to zero-padded input) -> force to zero.
        g = lax.broadcasted_iota(jnp.int32, (R1, 1), 0) + (i * TH - 1)
        hbuf[...] = jnp.where((g >= 0) & (g < H), h, 0.0)

        # ---- conv2 + bias + ReLU: lane-dense (TH, W*Cout) output tile -------
        acc2 = jnp.broadcast_to(b2_ref[...], (TH, W * Cout)).astype(jnp.float32)
        for kh in range(3):
            acc2 = acc2 + jnp.dot(hbuf[kh:kh + TH, :], t2_ref[kh],
                                  preferred_element_type=jnp.float32)
        o_ref[0] = jnp.maximum(acc2, 0.0).astype(o_ref.dtype)

    return kernel


@jax.jit
def down_block_forward(x_nchw, w1, b1, w2, b2):
    """DownBlock forward. x_nchw: (N, Cin, H, W) -> (N, Cout, H, W).

    Weights are stored channels-last: w1 (3,3,Cin,Cmid), w2 (3,3,Cmid,Cout).
    """
    N, Cin, H, W = x_nchw.shape
    Cmid = w1.shape[-1]
    Cout = w2.shape[-1]
    TH = _pick_row_tile(H)
    assert H % TH == 0
    nt = H // TH
    WP = W + 2

    # NCHW -> NHWC, add the 2-row / 1-col halo once (fuses with the transpose
    # copy), and flatten (W+2, Cin) so slab rows are lane-dense.
    x = jnp.transpose(x_nchw, (0, 2, 3, 1))
    x = jnp.pad(x, ((0, 0), (2, 2), (1, 1), (0, 0)))
    x = x.reshape(N, H + 4, WP * Cin)

    # Pre-slice overlapping (TH+4)-row halo slabs so the input fetch becomes a
    # plain Blocked BlockSpec and gets auto double-buffered by the Pallas
    # pipeline (previously a blocking in-kernel sync_copy).
    rows = jnp.arange(nt)[:, None] * TH + jnp.arange(TH + 4)[None, :]
    x_slabs = x[:, rows, :]                      # (N, nt, TH+4, WP*Cin)

    # Banded matmul weights + width-tiled bias rows (built outside the kernel).
    t1 = _band_weights(w1, W, pad_out=True)      # (3, (W+2)*Cin,  (W+2)*Cmid)
    t2 = _band_weights(w2, W, pad_out=False)     # (3, (W+2)*Cmid, W*Cout)
    b1r = _bias_row(b1, W, pad_out=True)         # (1, (W+2)*Cmid)
    b2r = _bias_row(b2, W, pad_out=False)        # (1, W*Cout)

    kernel = _make_double_conv_kernel(H, W, TH, Cin, Cmid, Cout)

    out = pl.pallas_call(
        kernel,
        out_shape=jax.ShapeDtypeStruct((N, H, W * Cout), x_nchw.dtype),
        grid_spec=pltpu.PrefetchScalarGridSpec(
            num_scalar_prefetch=0,
            grid=(N, nt),
            in_specs=[
                # leading (batch, tile) dims squeezed -> kernel sees 2-D slab
                pl.BlockSpec((None, None, TH + 4, WP * Cin),
                             lambda n, i: (n, i, 0, 0)),
                pl.BlockSpec(t1.shape, lambda n, i: (0, 0, 0)),
                pl.BlockSpec(b1r.shape, lambda n, i: (0, 0)),
                pl.BlockSpec(t2.shape, lambda n, i: (0, 0, 0)),
                pl.BlockSpec(b2r.shape, lambda n, i: (0, 0)),
            ],
            out_specs=pl.BlockSpec((1, TH, W * Cout), lambda n, i: (n, i, 0)),
            scratch_shapes=[
                pltpu.VMEM((TH + 2, WP * Cmid), jnp.float32),   # conv1 output
            ],
        ),
        compiler_params=pltpu.CompilerParams(
            dimension_semantics=("parallel", "parallel"),
            vmem_limit_bytes=32 * 1024 * 1024,     # explicit budget (v7x-safe)
        ),
    )(x_slabs, t1, b1r, t2, b2r)

    out = out.reshape(N, H, W, Cout)               # free: same HBM layout
    return jnp.transpose(out, (0, 3, 1, 2))        # back to NCHW


# ----------------------------------------------------------------------------
# Pure-JAX reference (lax.conv) for the correctness check.
# ----------------------------------------------------------------------------
def _reference_forward(x_nchw, w1, b1, w2, b2):
    def conv(x, w, b):
        w_oihw = jnp.transpose(w, (3, 2, 0, 1))
        y = lax.conv_general_dilated(
            x, w_oihw, window_strides=(1, 1), padding="SAME",
            dimension_numbers=("NCHW", "OIHW", "NCHW"))
        y = y + b.reshape(1, -1, 1, 1)
        return jnp.maximum(y, 0.0)
    return conv(conv(x_nchw, w1, b1), w2, b2)


if __name__ == "__main__":
    key = jax.random.PRNGKey(0)
    N, Cin, Cout, H, W = 2, 4, 8, 16, 16

    k_x, k_w1, k_b1, k_w2, k_b2 = jax.random.split(key, 5)
    x = jax.random.normal(k_x, (N, Cin, H, W), dtype=jnp.float32)

    # Conv2d(3x3) parameters, stored channels-last as (kh, kw, Cin, Cout).
    w1 = jax.random.normal(k_w1, (3, 3, Cin, Cout), dtype=jnp.float32) * 0.1
    b1 = jax.random.normal(k_b1, (Cout,), dtype=jnp.float32) * 0.1
    w2 = jax.random.normal(k_w2, (3, 3, Cout, Cout), dtype=jnp.float32) * 0.1
    b2 = jax.random.normal(k_b2, (Cout,), dtype=jnp.float32) * 0.1

    out = down_block_forward(x, w1, b1, w2, b2)
    out = jax.block_until_ready(out)

    ref = _reference_forward(x, w1, b1, w2, b2)
    assert out.shape == (N, Cout, H, W), out.shape
    err = float(jnp.max(jnp.abs(out - ref)))
    assert jnp.allclose(out, ref, atol=1e-4, rtol=1e-4), f"mismatch: {err}"

    print("KERNEL_OK")
</pallas_src>

<mosaic_0001>
module attributes {stable_mosaic.version = 11 : i64} {
  func.func @kernel(%arg0: i32, %arg1: i32, %arg2: memref<1x1x12x72xf32, #tpu.memory_space<vmem>>, %arg3: memref<3x72x144xf32, #tpu.memory_space<vmem>>, %arg4: memref<1x144xf32, #tpu.memory_space<vmem>>, %arg5: memref<3x144x128xf32, #tpu.memory_space<vmem>>, %arg6: memref<1x128xf32, #tpu.memory_space<vmem>>, %arg7: memref<1x8x128xf32, #tpu.memory_space<vmem>>, %arg8: memref<10x144xf32, #tpu.memory_space<vmem>>) attributes {dimension_semantics = [#tpu.dimension_semantics<parallel>, #tpu.dimension_semantics<parallel>], iteration_bounds = array<i64: 2, 2>, scalar_prefetch = 0 : i64, scratch_operands = 1 : i64, tpu.core_type = #tpu.core_type<tc>, window_params = [{transform_indices = @transform_0, window_bounds = array<i64: 1, 1, 12, 72>}, {pipeline_mode = #tpu.pipeline_mode<synchronous>, transform_indices = @transform_1, window_bounds = array<i64: 3, 72, 144>}, {pipeline_mode = #tpu.pipeline_mode<synchronous>, transform_indices = @transform_2, window_bounds = array<i64: 1, 144>}, {pipeline_mode = #tpu.pipeline_mode<synchronous>, transform_indices = @transform_3, window_bounds = array<i64: 3, 144, 128>}, {pipeline_mode = #tpu.pipeline_mode<synchronous>, transform_indices = @transform_4, window_bounds = array<i64: 1, 128>}, {transform_indices = @transform_5, window_bounds = array<i64: 1, 8, 128>}]} {
    %c0 = arith.constant 0 : index
    %c0_0 = arith.constant 0 : index
    %0 = vector.load %arg4[%c0, %c0_0] : memref<1x144xf32, #tpu.memory_space<vmem>>, vector<1x144xf32>
    %1 = vector.shape_cast %0 : vector<1x144xf32> to vector<1x144xf32>
    %2 = vector.broadcast %1 : vector<1x144xf32> to vector<10x144xf32>
    %c0_1 = arith.constant 0 : index
    %c0_2 = arith.constant 0 : index
    %c0_3 = arith.constant 0 : index
    %c0_4 = arith.constant 0 : index
    %3 = vector.load %arg2[%c0_1, %c0_2, %c0_3, %c0_4] : memref<1x1x12x72xf32, #tpu.memory_space<vmem>>, vector<1x1x10x72xf32>
    %4 = vector.shape_cast %3 : vector<1x1x10x72xf32> to vector<10x72xf32>
    %c0_5 = arith.constant 0 : index
    %c0_6 = arith.constant 0 : index
    %c0_7 = arith.constant 0 : index
    %5 = vector.load %arg3[%c0_5, %c0_6, %c0_7] : memref<3x72x144xf32, #tpu.memory_space<vmem>>, vector<1x72x144xf32>
    %6 = vector.shape_cast %5 : vector<1x72x144xf32> to vector<72x144xf32>
    %cst = arith.constant dense<0.000000e+00> : vector<10x144xf32>
    %7 = tpu.matmul %4, %6, %cst {dimension_numbers = #tpu.dot_dimension_numbers<[1], [0], [0], [1], [0, 0, 1, 1], [], []>} : vector<10x72xf32>, vector<72x144xf32>, vector<10x144xf32> -> vector<10x144xf32>
    %8 = arith.addf %2, %7 : vector<10x144xf32>
    %c0_8 = arith.constant 0 : index
    %c0_9 = arith.constant 0 : index
    %c1 = arith.constant 1 : index
    %c0_10 = arith.constant 0 : index
    %9 = vector.load %arg2[%c0_8, %c0_9, %c1, %c0_10] : memref<1x1x12x72xf32, #tpu.memory_space<vmem>>, vector<1x1x10x72xf32>
    %10 = vector.shape_cast %9 : vector<1x1x10x72xf32> to vector<10x72xf32>
    %c1_11 = arith.constant 1 : index
    %c0_12 = arith.constant 0 : index
    %c0_13 = arith.constant 0 : index
    %11 = vector.load %arg3[%c1_11, %c0_12, %c0_13] : memref<3x72x144xf32, #tpu.memory_space<vmem>>, vector<1x72x144xf32>
    %12 = vector.shape_cast %11 : vector<1x72x144xf32> to vector<72x144xf32>
    %cst_14 = arith.constant dense<0.000000e+00> : vector<10x144xf32>
    %13 = tpu.matmul %10, %12, %cst_14 {dimension_numbers = #tpu.dot_dimension_numbers<[1], [0], [0], [1], [0, 0, 1, 1], [], []>} : vector<10x72xf32>, vector<72x144xf32>, vector<10x144xf32> -> vector<10x144xf32>
    %14 = arith.addf %8, %13 : vector<10x144xf32>
    %c0_15 = arith.constant 0 : index
    %c0_16 = arith.constant 0 : index
    %c2 = arith.constant 2 : index
    %c0_17 = arith.constant 0 : index
    %15 = vector.load %arg2[%c0_15, %c0_16, %c2, %c0_17] : memref<1x1x12x72xf32, #tpu.memory_space<vmem>>, vector<1x1x10x72xf32>
    %16 = vector.shape_cast %15 : vector<1x1x10x72xf32> to vector<10x72xf32>
    %c2_18 = arith.constant 2 : index
    %c0_19 = arith.constant 0 : index
    %c0_20 = arith.constant 0 : index
    %17 = vector.load %arg3[%c2_18, %c0_19, %c0_20] : memref<3x72x144xf32, #tpu.memory_space<vmem>>, vector<1x72x144xf32>
    %18 = vector.shape_cast %17 : vector<1x72x144xf32> to vector<72x144xf32>
    %cst_21 = arith.constant dense<0.000000e+00> : vector<10x144xf32>
    %19 = tpu.matmul %16, %18, %cst_21 {dimension_numbers = #tpu.dot_dimension_numbers<[1], [0], [0], [1], [0, 0, 1, 1], [], []>} : vector<10x72xf32>, vector<72x144xf32>, vector<10x144xf32> -> vector<10x144xf32>
    %20 = arith.addf %14, %19 : vector<10x144xf32>
    %cst_22 = arith.constant 0.000000e+00 : f32
    %21 = vector.broadcast %cst_22 : f32 to vector<10x144xf32>
    %22 = arith.maximumf %20, %21 : vector<10x144xf32>
    %23 = tpu.iota {dimensions = array<i32: 0>} : vector<10x1xi32>
    %c8_i32 = arith.constant 8 : i32
    %24 = arith.muli %arg1, %c8_i32 : i32
    %c1_i32 = arith.constant 1 : i32
    %25 = arith.subi %24, %c1_i32 : i32
    %26 = vector.broadcast %25 : i32 to vector<10x1xi32>
    %27 = arith.addi %23, %26 : vector<10x1xi32>
    %c0_i32 = arith.constant 0 : i32
    %28 = vector.broadcast %c0_i32 : i32 to vector<10x1xi32>
    %29 = arith.cmpi sge, %27, %28 : vector<10x1xi32>
    %c16_i32 = arith.constant 16 : i32
    %30 = vector.broadcast %c16_i32 : i32 to vector<10x1xi32>
    %31 = arith.cmpi slt, %27, %30 : vector<10x1xi32>
    %32 = arith.andi %29, %31 : vector<10x1xi1>
    %cst_23 = arith.constant 0.000000e+00 : f32
    %33 = vector.shape_cast %32 : vector<10x1xi1> to vector<10x1xi1>
    %34 = vector.broadcast %33 : vector<10x1xi1> to vector<10x144xi1>
    %35 = vector.broadcast %cst_23 : f32 to vector<10x144xf32>
    %36 = arith.select %34, %22, %35 : vector<10x144xi1>, vector<10x144xf32>
    %c0_24 = arith.constant 0 : index
    %c0_25 = arith.constant 0 : index
    %37 = vector.load %arg8[%c0_24, %c0_25] : memref<10x144xf32, #tpu.memory_space<vmem>>, vector<10x144xf32>
    tpu.vector_store %arg8[%c0_24, %c0_25], %36 {strides = array<i32>} : memref<10x144xf32, #tpu.memory_space<vmem>>, vector<10x144xf32>,
    %c0_26 = arith.constant 0 : index
    %c0_27 = arith.constant 0 : index
    %38 = vector.load %arg6[%c0_26, %c0_27] : memref<1x128xf32, #tpu.memory_space<vmem>>, vector<1x128xf32>
    %39 = vector.shape_cast %38 : vector<1x128xf32> to vector<1x128xf32>
    %40 = vector.broadcast %39 : vector<1x128xf32> to vector<8x128xf32>
    %c0_28 = arith.constant 0 : index
    %c0_29 = arith.constant 0 : index
    %41 = vector.load %arg8[%c0_28, %c0_29] : memref<10x144xf32, #tpu.memory_space<vmem>>, vector<8x144xf32>
    %c0_30 = arith.constant 0 : index
    %c0_31 = arith.constant 0 : index
    %c0_32 = arith.constant 0 : index
    %42 = vector.load %arg5[%c0_30, %c0_31, %c0_32] : memref<3x144x128xf32, #tpu.memory_space<vmem>>, vector<1x144x128xf32>
    %43 = vector.shape_cast %42 : vector<1x144x128xf32> to vector<144x128xf32>
    %cst_33 = arith.constant dense<0.000000e+00> : vector<8x128xf32>
    %44 = tpu.matmul %41, %43, %cst_33 {dimension_numbers = #tpu.dot_dimension_numbers<[1], [0], [0], [1], [0, 0, 1, 1], [], []>} : vector<8x144xf32>, vector<144x128xf32>, vector<8x128xf32> -> vector<8x128xf32>
    %45 = arith.addf %40, %44 : vector<8x128xf32>
    %c1_34 = arith.constant 1 : index
    %c0_35 = arith.constant 0 : index
    %46 = vector.load %arg8[%c1_34, %c0_35] : memref<10x144xf32, #tpu.memory_space<vmem>>, vector<8x144xf32>
    %c1_36 = arith.constant 1 : index
    %c0_37 = arith.constant 0 : index
    %c0_38 = arith.constant 0 : index
    %47 = vector.load %arg5[%c1_36, %c0_37, %c0_38] : memref<3x144x128xf32, #tpu.memory_space<vmem>>, vector<1x144x128xf32>
    %48 = vector.shape_cast %47 : vector<1x144x128xf32> to vector<144x128xf32>
    %cst_39 = arith.constant dense<0.000000e+00> : vector<8x128xf32>
    %49 = tpu.matmul %46, %48, %cst_39 {dimension_numbers = #tpu.dot_dimension_numbers<[1], [0], [0], [1], [0, 0, 1, 1], [], []>} : vector<8x144xf32>, vector<144x128xf32>, vector<8x128xf32> -> vector<8x128xf32>
    %50 = arith.addf %45, %49 : vector<8x128xf32>
    %c2_40 = arith.constant 2 : index
    %c0_41 = arith.constant 0 : index
    %51 = vector.load %arg8[%c2_40, %c0_41] : memref<10x144xf32, #tpu.memory_space<vmem>>, vector<8x144xf32>
    %c2_42 = arith.constant 2 : index
    %c0_43 = arith.constant 0 : index
    %c0_44 = arith.constant 0 : index
    %52 = vector.load %arg5[%c2_42, %c0_43, %c0_44] : memref<3x144x128xf32, #tpu.memory_space<vmem>>, vector<1x144x128xf32>
    %53 = vector.shape_cast %52 : vector<1x144x128xf32> to vector<144x128xf32>
    %cst_45 = arith.constant dense<0.000000e+00> : vector<8x128xf32>
    %54 = tpu.matmul %51, %53, %cst_45 {dimension_numbers = #tpu.dot_dimension_numbers<[1], [0], [0], [1], [0, 0, 1, 1], [], []>} : vector<8x144xf32>, vector<144x128xf32>, vector<8x128xf32> -> vector<8x128xf32>
    %55 = arith.addf %50, %54 : vector<8x128xf32>
    %cst_46 = arith.constant 0.000000e+00 : f32
    %56 = vector.broadcast %cst_46 : f32 to vector<8x128xf32>
    %57 = arith.maximumf %55, %56 : vector<8x128xf32>
    %c0_47 = arith.constant 0 : index
    %c0_48 = arith.constant 0 : index
    %c0_49 = arith.constant 0 : index
    %58 = vector.load %arg7[%c0_47, %c0_48, %c0_49] : memref<1x8x128xf32, #tpu.memory_space<vmem>>, vector<1x8x128xf32>
    %59 = vector.shape_cast %58 : vector<1x8x128xf32> to vector<8x128xf32>
    %60 = vector.shape_cast %57 : vector<8x128xf32> to vector<1x8x128xf32>
    tpu.vector_store %arg7[%c0_47, %c0_48, %c0_49], %60 {strides = array<i32>} : memref<1x8x128xf32, #tpu.memory_space<vmem>>, vector<1x8x128xf32>,
    return
  }
  func.func @transform_0(%arg0: i32, %arg1: i32) -> (i32, i32, i32, i32) {
    %c0_i32 = arith.constant 0 : i32
    %c0_i32_0 = arith.constant 0 : i32
    %c0_i32_1 = arith.constant 0 : i32
    return %arg0, %arg1, %c0_i32, %c0_i32_0 : i32, i32, i32, i32
  }
  func.func @transform_1(%arg0: i32, %arg1: i32) -> (i32, i32, i32) {
    %c0_i32 = arith.constant 0 : i32
    %c0_i32_0 = arith.constant 0 : i32
    %c0_i32_1 = arith.constant 0 : i32
    %c0_i32_2 = arith.constant 0 : i32
    return %c0_i32, %c0_i32_0, %c0_i32_1 : i32, i32, i32
  }
  func.func @transform_2(%arg0: i32, %arg1: i32) -> (i32, i32) {
    %c0_i32 = arith.constant 0 : i32
    %c0_i32_0 = arith.constant 0 : i32
    %c0_i32_1 = arith.constant 0 : i32
    return %c0_i32, %c0_i32_0 : i32, i32
  }
  func.func @transform_3(%arg0: i32, %arg1: i32) -> (i32, i32, i32) {
    %c0_i32 = arith.constant 0 : i32
    %c0_i32_0 = arith.constant 0 : i32
    %c0_i32_1 = arith.constant 0 : i32
    %c0_i32_2 = arith.constant 0 : i32
    return %c0_i32, %c0_i32_0, %c0_i32_1 : i32, i32, i32
  }
  func.func @transform_4(%arg0: i32, %arg1: i32) -> (i32, i32) {
    %c0_i32 = arith.constant 0 : i32
    %c0_i32_0 = arith.constant 0 : i32
    %c0_i32_1 = arith.constant 0 : i32
    return %c0_i32, %c0_i32_0 : i32, i32
  }
  func.func @transform_5(%arg0: i32, %arg1: i32) -> (i32, i32, i32) {
    %c0_i32 = arith.constant 0 : i32
    %c0_i32_0 = arith.constant 0 : i32
    return %arg0, %arg1, %c0_i32 : i32, i32, i32
  }
}

</mosaic_0001>

<bundles_post_ra>
// kernel: down_block_forward.1
= control target key start
LH: loop header
LB: loop body
LE: loop exit
PB: predicated region body
PF: predicated region fallthrough
CT: control target
= control target key end

     0   :  { %s1391_s18 = smov 0   ;;  %s1393_s19 = smov 0   ;;  %s1854_s0 = inlined_call_operand.vmem [shape: f32[2,2,12,72], index: 0, kind: input, shape index: {}]   ;;  %s1855_s1 = inlined_call_operand.vmem [shape: f32[3,72,144], index: 1, kind: input, shape index: {}]   ;;  %s1856_s2 = inlined_call_operand.vmem [shape: f32[1,144], index: 2, kind: input, shape index: {}]   ;;  %s1857_s3 = inlined_call_operand.vmem [shape: f32[3,144,128], index: 3, kind: input, shape index: {}]   ;;  %s1858_s4 = inlined_call_operand.vmem [shape: f32[1,128], index: 4, kind: input, shape index: {}]   ;;  %s1859_s5 = inlined_call_operand.vmem [shape: f32[2,16,128], index: 5, kind: output, shape index: {}]  }
   0x1   :  { %s1395_s20 = smov 0   ;;  %s1397_s21 = smov 0  }
   0x2   :  { %s1399_s22 = smov 0  }
   0x3 LB: > { %s24_s23 = sadd.s32 1, %s1349_s20  ;;  %s27_s24 = sadd.s32 1, %s1353_s21  ;;  %s1357_s22 = sphi %s1399_s22, %s15_s22   ;;  %s1353_s21 = sphi %s1397_s21, %s1865_s21   ;;  %s1349_s20 = sphi %s1395_s20, %s1864_s20   ;;  %s1345_s19 = sphi %s1393_s19, %s1863_s19   ;;  %s1341_s18 = sphi %s1391_s18, %s1862_s18  }
   0x4   : > { %p25_p0 = scmp.ge.s32.totalorder %s24_s23, 2  ;;  %p1039_p1 = scmp.ge.s32.totalorder %s1357_s22, 1 }
   0x5   : > { %p207_p2 = scmp.lt.s32.totalorder %s1357_s22, 5 }
   0x6   : > { %s1867_s23 = smov (%p25_p0, %s24_s23), 0  ;;  %s1869_s24 = smov (!%p25_p0, %s27_s24), %s1353_s21 }
   0x7   : > { %p208_p3 = pnand %p1039_p1, %p207_p2  ;;  %p29_p4 = scmp.ge.s32.totalorder %s1869_s24, 2 }
   0x8   : > { %v274_v0 = vld [vmem:[%s1855_s1 + $0x8] sm:$0xff] (!%p208_p3)  ;;  %v276_v1 = vld [vmem:[%s1855_s1 + $0x18] sm:$0xff] (!%p208_p3)  ;;  %v273_v2 = vld [vmem:[%s1855_s1] sm:$0xff] (!%p208_p3)  ;;  %p242_p5 = scmp.lt.s32.totalorder (!%p208_p3), %s1345_s19, 1  ;;  %p244_p6 = scmp.lt.s32.totalorder (!%p208_p3), %s1341_s18, 1  ;;  %v1359_v7 = vmov (!%p208_p3), 0.0  }
   0x9   : > { %s1871_s24 = smov (%p29_p4, %s1869_s24), 0  ;;  %211 = sbr.rel (%p208_p3) target bundleno = 553 (0x229), region = 40 }
   0xa   : > { %v1131_v3 = vpack.c.bf16 (!%p208_p3), %v276_v1, %v274_v0  ;;  %v275_v4 = vld [vmem:[%s1855_s1 + $0x10] sm:$0xff] (!%p208_p3)  ;;  %v278_v5 = vld [vmem:[%s1855_s1 + $0x28] sm:$0xff] (!%p208_p3)  ;;  %v280_v6 = vld [vmem:[%s1855_s1 + $0x38] sm:$0xff] (!%p208_p3)  ;;  %362 = vmatprep.mubr.f32.mxu0 (!%p208_p3), %v1359_v7  ;;  %v1360_v13 = vmov (!%p208_p3), 0.0|0.0   ;;  %vm291_vm0 = vcmask (!%p208_p3), 588800   ;;  %s1087_s30 = sshll.u32 (!%p208_p3), %s1341_s18, 3 }
   0xb   : > { %v1133_v8 = vpack.c.bf16 (!%p208_p3), %v275_v4, %v273_v2  ;;  %v1135_v9 = vpack.c.bf16 (!%p208_p3), %v280_v6, %v278_v5  ;;  %v277_v10 = vld [vmem:[%s1855_s1 + $0x20] sm:$0xff] (!%p208_p3)  ;;  %v279_v11 = vld [vmem:[%s1855_s1 + $0x30] sm:$0xff] (!%p208_p3)  ;;  %v282_v12 = vld [vmem:[%s1855_s1 + $0x48] sm:$0xff] (!%p208_p3)  ;;  %1206 = vmatprep.subr.bf16.mxu1 (!%p208_p3), %v1360_v13  ;;  %s1088_s6 = sadd.s32 (!%p208_p3), 4294967295, %s1087_s30  ;;  %vm622_vm6 = vcmask (!%p208_p3), 130048   ;;  %vm625_vm8 = vcmask (!%p208_p3), 123904  }
   0xc   : > { %1132 = vmatprep.subr.bf16.mxu0 (!%p208_p3), %v1131_v3  ;;  %v284_v14 = vld [vmem:[%s1855_s1 + $0x58] sm:$0xff] (!%p208_p3)  ;;  %v1137_v15 = vpack.c.bf16 (!%p208_p3), %v279_v11, %v277_v10  ;;  %v281_v17 = vld [vmem:[%s1855_s1 + $0x40] sm:$0xff] (!%p208_p3)  ;;  %v283_v18 = vld [vmem:[%s1855_s1 + $0x50] sm:$0xff] (!%p208_p3)  ;;  %vm755_vm9 = vcmask (!%p208_p3), 1046528   ;;  %vm863_vm10 = vcmask (!%p208_p3), 1045504  }
   0xd   : > { %1134 = vmatpush1.bf16.msra.mxu0 (!%p208_p3), %v1133_v8  ;;  %v1139_v16 = vpack.c.bf16 (!%p208_p3), %v284_v14, %v282_v12  ;;  %v286_v19 = vld [vmem:[%s1855_s1 + $0x68] sm:$0xff] (!%p208_p3)  ;;  %v288_v20 = vld [vmem:[%s1855_s1 + $0x78] sm:$0xff] (!%p208_p3)  ;;  %v1141_v21 = vpack.c.bf16 (!%p208_p3), %v283_v18, %v281_v17  ;;  %v285_v23 = vld [vmem:[%s1855_s1 + $0x60] sm:$0xff] (!%p208_p3) }
   0xe   : > { %1136 = vmatprep.subr.bf16.mxu0 (!%p208_p3), %v1135_v9  ;;  %v1143_v22 = vpack.c.bf16 (!%p208_p3), %v288_v20, %v286_v19  ;;  %v287_v24 = vld [vmem:[%s1855_s1 + $0x70] sm:$0xff] (!%p208_p3)  ;;  %v290_v26 = vld [vmem:[%s1855_s1 + $0x88] sm:$0xff] (!%p208_p3)  ;;  %v1048_v27 = vld [vmem:[%s1855_s1 + $0x98] sm:$0xff] (!%p208_p3) }
   0xf   : > { %v1145_v25 = vpack.c.bf16 (!%p208_p3), %v287_v24, %v285_v23  ;;  %v1050_v28 = vld [vmem:[%s1855_s1 + $0xa8] sm:$0xff] (!%p208_p3)  ;;  %v1047_v29 = vld [vmem:[%s1855_s1 + $0x90] sm:$0xff] (!%p208_p3)  ;;  %v1049_v30 = vld [vmem:[%s1855_s1 + $0xa0] sm:$0xff] (!%p208_p3) }
  0x10   : > { %s1873_s19 = smov (!%p242_p5, %s1345_s19), 1  ;;  %v1052_v31 = vld [vmem:[%s1855_s1 + $0xb8] sm:$0xff]  ;;  %v1054_v32 = vld [vmem:[%s1855_s1 + $0xc8] sm:$0xff]  ;;  %v289_v33 = vld [vmem:[%s1855_s1 + $0x80] sm:$0xff]  ;;  %v1147_v34 = vpack.c.bf16 %v1050_v28, %v1048_v27  ;;  %v1149_v36 = vpack.c.bf16 %v1049_v30, %v1047_v29 }
  0x11   : > { %s1465_s27 = scalar_select %p244_p6, %s1341_s18, 1  ;;  %1138 = vmatpush1.bf16.msra.mxu0 %v1137_v15  ;;  %v1151_v37 = vpack.c.bf16 %v1054_v32, %v1052_v31  ;;  %v1051_v38 = vld [vmem:[%s1855_s1 + $0xb0] sm:$0xff]  ;;  %v1053_v39 = vld [vmem:[%s1855_s1 + $0xc0] sm:$0xff]  ;;  %v1056_v40 = vld [vmem:[%s1855_s1 + $0xd8] sm:$0xff] }
  0x12   : > { %s1041_s12 = sshll.u32 %s1873_s19, 2  ;;  %1140 = vmatprep.subr.bf16.mxu0 %v1139_v16  ;;  %v1058_v41 = vld [vmem:[%s1855_s1 + $0xe8] sm:$0xff]  ;;  %v1091_v42 = vld [vmem:[%s1857_s3 + $0x90] sm:$0xff]  ;;  %v1092_v43 = vld [vmem:[%s1857_s3 + $0x98] sm:$0xff]  ;;  %v1153_v44 = vpack.c.bf16 %v1053_v39, %v1051_v38  ;;  %s1043_s18 = sshll.u32 %s1873_s19, 1 }
  0x13   : > { %s1040_s11 = sshll.u32 %s1465_s27, 1  ;;  %v1207_v46 = vpack.c.bf16 %v1092_v43, %v1091_v42  ;;  %v1093_v47 = vld [vmem:[%s1857_s3 + $0xa0] sm:$0xff]  ;;  %v1155_v48 = vpack.c.bf16 %v1058_v41, %v1056_v40  ;;  %v1055_v49 = vld [vmem:[%s1855_s1 + $0xd0] sm:$0xff]  ;;  %v1094_v51 = vld [vmem:[%s1857_s3 + $0xa8] sm:$0xff] }
  0x14   : > { %s248_s17 = sadd.s32 %s1041_s12, %s1040_s11  ;;  %v1057_v50 = vld [vmem:[%s1855_s1 + $0xe0] sm:$0xff]  ;;  %v1060_v52 = vld [vmem:[%s1855_s1 + $0xf8] sm:$0xff]  ;;  %v1062_v53 = vld [vmem:[%s1855_s1 + $0x108] sm:$0xff]  ;;  %v1210_v54 = vpack.c.bf16 %v1094_v51, %v1093_v47  ;;  %s256_s12 = sadd.s32 %s1043_s18, %s1465_s27 }
  0x15   : > { %1142 = vmatpush1.bf16.msra.mxu0 %v1141_v21  ;;  %s1042_s25 = sshll.u32 %s248_s17, 3  ;;  %1208 = vmatpush1.bf16.msra.mxu1 %v1207_v46  ;;  %v1095_v55 = vld [vmem:[%s1857_s3 + $0xb0] sm:$0xff]  ;;  %v1096_v56 = vld [vmem:[%s1857_s3 + $0xb8] sm:$0xff]  ;;  %v1157_v57 = vpack.c.bf16 %v1057_v50, %v1055_v49  ;;  %v1159_v58 = vpack.c.bf16 %v1062_v53, %v1060_v52  ;;  %v1061_v60 = vld [vmem:[%s1855_s1 + $0x100] sm:$0xff]  ;;  %s1044_s13 = sshll.u32 %s256_s12, 3 }
  0x16   : > { %1144 = vmatprep.subr.bf16.mxu0 %v1143_v22  ;;  %s1499_s10 = scalar_lea.vmem %s1854_s0, %s1042_s25  ;;  %1209 = vmatprep.subr.bf16.mxu1 %v1360_v13  ;;  %v1059_v59 = vld [vmem:[%s1855_s1 + $0xf0] sm:$0xff]  ;;  %v1213_v61 = vpack.c.bf16 %v1096_v56, %v1095_v55  ;;  %v1097_v62 = vld [vmem:[%s1857_s3 + $0xc0] sm:$0xff]  ;;  %v1098_v63 = vld [vmem:[%s1857_s3 + $0xc8] sm:$0xff]  ;;  %s258_s15 = scalar_lea.vmem %s1859_s5, %s1044_s13 }
  0x17   : > { %v271_v35 = vld [vmem:[%s1499_s10] sm:$0xff]  ;;  %v272_v45 = vld [vmem:[%s1499_s10 + $0x8] sm:$0x3]  ;;  %v1161_v0 = vpack.c.bf16 %v1061_v60, %v1059_v59  ;;  %v1064_v1 = vld [vmem:[%s1855_s1 + $0x118] sm:$0xff]  ;;  %v1216_v4 = vpack.c.bf16 %v1098_v63, %v1097_v62 }
  0x18   : > { %v1068_v2 = vld [vmem:[%s1855_s1 + $0x128] sm:$0xff]  ;;  %v1070_v3 = vld [vmem:[%s1855_s1 + $0x138] sm:$0xff]  ;;  %v1067_v5 = vld [vmem:[%s1855_s1 + $0x120] sm:$0xff] }
  0x19   : > { %1146 = vmatpush1.bf16.msra.mxu0 %v1145_v25  ;;  %1211 = vmatpush1.bf16.msra.mxu1 %v1210_v54  ;;  %v1069_v6 = vld [vmem:[%s1855_s1 + $0x130] sm:$0xff]  ;;  %v1072_v8 = vld [vmem:[%s1855_s1 + $0x148] sm:$0xff]  ;;  %v1074_v9 = vld [vmem:[%s1855_s1 + $0x158] sm:$0xff]  ;;  %v1163_v11 = vpack.c.bf16 %v1070_v3, %v1068_v2 }
  0x1a   : > { %314 = vmatprep.subr.mxu0 %v290_v26  ;;  %1212 = vmatprep.subr.bf16.mxu1 %v1360_v13  ;;  %v1063_v10 = vld [vmem:[%s1855_s1 + $0x110] sm:$0xff]  ;;  %v379_v12 = vld [vmem:[%s1499_s10 + $0x1] sm:$0xff]  ;;  %v1165_v14 = vpack.c.bf16 %v1069_v6, %v1067_v5  ;;  %v1167_v15 = vpack.c.bf16 %v1074_v9, %v1072_v8  ;;  %v1078_v19 = vld [vmem:[%s1855_s1 + $0x178] sm:$0xff] }
  0x1b   : > { %v1071_v16 = vld [vmem:[%s1855_s1 + $0x140] sm:$0xff]  ;;  %v1073_v17 = vld [vmem:[%s1855_s1 + $0x150] sm:$0xff]  ;;  %v1076_v18 = vld [vmem:[%s1855_s1 + $0x168] sm:$0xff] }
  0x1c   : > { %v1169_v20 = vpack.c.bf16 %v1073_v17, %v1071_v16  ;;  %v380_v21 = vld [vmem:[%s1499_s10 + $0x9] sm:$0x3]  ;;  %v1171_v22 = vpack.c.bf16 %v1078_v19, %v1076_v18  ;;  %v1075_v23 = vld [vmem:[%s1855_s1 + $0x160] sm:$0xff]  ;;  %v1077_v24 = vld [vmem:[%s1855_s1 + $0x170] sm:$0xff]  ;;  %v604_v17 = vstv %s1088_s6 }
  0x1d   : > { %315 = vmatpush1.msra.mxu0 %v289_v33  ;;  %1214 = vmatpush1.bf16.msra.mxu1 %v1213_v61  ;;  %v1080_v25 = vld [vmem:[%s1855_s1 + $0x188] sm:$0xff]  ;;  %v1082_v26 = vld [vmem:[%s1855_s1 + $0x198] sm:$0xff]  ;;  %v1173_v27 = vpack.c.bf16 %v1077_v24, %v1075_v23  ;;  %v1079_v29 = vld [vmem:[%s1855_s1 + $0x180] sm:$0xff] }
  0x1e   : > { %1148 = vmatprep.subr.bf16.mxu0 %v1147_v34  ;;  %1045 = vmatmul.mubr.msk.f32.vlgmr.msra.gmra.mrb[0].mxu0 %vm291_vm0, %v271_v35  ;;  %v1175_v28 = vpack.c.bf16 %v1082_v26, %v1080_v25  ;;  %v1081_v30 = vld [vmem:[%s1855_s1 + $0x190] sm:$0xff]  ;;  %v1084_v32 = vld [vmem:[%s1855_s1 + $0x1a8] sm:$0xff]  ;;  %v636_v33 = vld [vmem:[%s1857_s3] sm:$0xff] }
  0x1f   : > { %1150 = vmatpush1.bf16.msra.mxu0 %v1149_v36  ;;  %368 = vmatprep.mubr.f32.mxu0 %v1359_v7  ;;  %v1177_v31 = vpack.c.bf16 %v1081_v30, %v1079_v29  ;;  %v637_v34 = vld [vmem:[%s1857_s3 + $0x8] sm:$0xff]  ;;  %v1083_v35 = vld [vmem:[%s1855_s1 + $0x1a0] sm:$0xff]  ;;  %v638_v38 = vld [vmem:[%s1857_s3 + $0x10] sm:$0xff] }
  0x20   : > { %1152 = vmatprep.subr.bf16.mxu0 %v1151_v37  ;;  %1215 = vmatprep.subr.bf16.mxu1 %v1360_v13  ;;  %v487_v36 = vld [vmem:[%s1499_s10 + $0x2] sm:$0xff]  ;;  %v1180_v37 = vpack.c.bf16 %v637_v34, %v636_v33  ;;  %v639_v39 = vld [vmem:[%s1857_s3 + $0x18] sm:$0xff]  ;;  %v488_v40 = vld [vmem:[%s1499_s10 + $0xa] sm:$0x3] }
  0x21   : > { %1217 = vmatpush1.bf16.msra.mxu1 %v1216_v4  ;;  %v1183_v41 = vpack.c.bf16 %v639_v39, %v638_v38  ;;  %v640_v42 = vld [vmem:[%s1857_s3 + $0x20] sm:$0xff]  ;;  %v641_v43 = vld [vmem:[%s1857_s3 + $0x28] sm:$0xff]  ;;  %v646_v50 = vld [vmem:[%s1857_s3 + $0x50] sm:$0xff] }
  0x22   : > { %1046 = vmatmul.mubr.msk.f32.gmra.mrb[2].mxu0 %vm291_vm0, %v272_v45  ;;  %1218 = vmatprep.subr.bf16.mxu1 %v1360_v13  ;;  %v643_v45 = vld [vmem:[%s1857_s3 + $0x38] sm:$0xff]  ;;  %v644_v47 = vld [vmem:[%s1857_s3 + $0x40] sm:$0xff]  ;;  %v1099_v53 = vld [vmem:[%s1857_s3 + $0xd0] sm:$0xff] }
  0x23   : > { %1154 = vmatpush1.bf16.msra.mxu0 %v1153_v44  ;;  %470 = vmatprep.mubr.f32.mxu0 %v1359_v7  ;;  %v1186_v44 = vpack.c.bf16 %v641_v43, %v640_v42  ;;  %v647_v51 = vld [vmem:[%s1857_s3 + $0x58] sm:$0xff]  ;;  %v648_v56 = vld [vmem:[%s1857_s3 + $0x60] sm:$0xff]  ;;  %v1102_v60 = vld [vmem:[%s1857_s3 + $0xe8] sm:$0xff] }
  0x24   : > { %1156 = vmatprep.subr.bf16.mxu0 %v1155_v48  ;;  %v645_v48 = vld [vmem:[%s1857_s3 + $0x48] sm:$0xff]  ;;  %v1195_v52 = vpack.c.bf16 %v647_v51, %v646_v50  ;;  %v1100_v54 = vld [vmem:[%s1857_s3 + $0xd8] sm:$0xff]  ;;  %v1101_v59 = vld [vmem:[%s1857_s3 + $0xe0] sm:$0xff] }
  0x25   : > { %v1192_v49 = vpack.c.bf16 %v645_v48, %v644_v47  ;;  %v1219_v55 = vpack.c.bf16 %v1100_v54, %v1099_v53  ;;  %v1222_v61 = vpack.c.bf16 %v1102_v60, %v1101_v59  ;;  %v650_v62 = vld [vmem:[%s1857_s3 + $0x70] sm:$0xff]  ;;  %v651_v63 = vld [vmem:[%s1857_s3 + $0x78] sm:$0xff]  ;;  %v652_v4 = vld [vmem:[%s1857_s3 + $0x80] sm:$0xff] }
  0x26   : > { %v1104_v2 = vld [vmem:[%s1857_s3 + $0xf8] sm:$0xff]  ;;  %v653_v5 = vld [vmem:[%s1857_s3 + $0x88] sm:$0xff]  ;;  %v1105_v8 = vld [vmem:[%s1857_s3 + $0x100] sm:$0xff] }
  0x27   : > { %1158 = vmatpush1.bf16.msra.mxu0 %v1157_v57  ;;  %v649_v57 = vld [vmem:[%s1857_s3 + $0x68] sm:$0xff]  ;;  %1220 = vmatpush1.bf16.msra.mxu1 %v1219_v55  ;;  %v1204_v6 = vpack.c.bf16 %v653_v5, %v652_v4  ;;  %v259_v19 = vld [vmem:[%s1856_s2] sm:$0x3]  ;;  %v1112_v59 = vld [vmem:[%s1857_s3 + $0x130] sm:$0xff] }
  0x28   : > { %1160 = vmatprep.subr.bf16.mxu0 %v1159_v58  ;;  %v1198_v58 = vpack.c.bf16 %v649_v57, %v648_v56  ;;  %1221 = vmatprep.subr.bf16.mxu1 %v1360_v13  ;;  %v1106_v9 = vld [vmem:[%s1857_s3 + $0x108] sm:$0xff]  ;;  %v1113_v60 = vld [vmem:[%s1857_s3 + $0x138] sm:$0xff] }
  0x29   : > { %v1117_v4 = vld [vmem:[%s1857_s3 + $0x158] sm:$0xff] }
  0x2b   : > { %1162 = vmatpush1.bf16.msra.mxu0 %v1161_v0  ;;  %1223 = vmatpush1.bf16.msra.mxu1 %v1222_v61  ;;  %v1201_v0 = vpack.c.bf16 %v651_v63, %v650_v62  ;;  %v1237_v63 = vpack.c.bf16 %v1113_v60, %v1112_v59 }
  0x2c   : > { %422 = vmatprep.subr.mxu0 %v1064_v1  ;;  %1224 = vmatprep.subr.bf16.mxu1 %v1360_v13  ;;  %v1103_v1 = vld [vmem:[%s1857_s3 + $0xf0] sm:$0xff] }
  0x2d   : > { %v1225_v3 = vpack.c.bf16 %v1104_v2, %v1103_v1  ;;  %v1115_v1 = vld [vmem:[%s1857_s3 + $0x148] sm:$0xff] }
  0x2f   : > { %423 = vmatpush1.msra.mxu0 %v1063_v10  ;;  %1226 = vmatpush1.bf16.msra.mxu1 %v1225_v3  ;;  %v1228_v10 = vpack.c.bf16 %v1106_v9, %v1105_v8  ;;  %v1116_v3 = vld [vmem:[%s1857_s3 + $0x150] sm:$0xff]  ;;  %v1119_v8 = vld [vmem:[%s1857_s3 + $0x168] sm:$0xff] }
  0x30   : > { %1164 = vmatprep.subr.bf16.mxu0 %v1163_v11  ;;  %1065 = vmatmul.mubr.msk.f32.vlgmr.msra.gmra.mrb[0].mxu0 %vm291_vm0, %v379_v12  ;;  %v1107_v11 = vld [vmem:[%s1857_s3 + $0x110] sm:$0xff]  ;;  %v1108_v12 = vld [vmem:[%s1857_s3 + $0x118] sm:$0xff]  ;;  %v1243_v5 = vpack.c.bf16 %v1117_v4, %v1116_v3 }
  0x31   : > { %1166 = vmatpush1.bf16.msra.mxu0 %v1165_v14  ;;  %476 = vmatprep.mubr.f32.mxu0 %v1359_v7  ;;  %v1231_v14 = vpack.c.bf16 %v1108_v12, %v1107_v11  ;;  %v1121_v11 = vld [vmem:[%s1857_s3 + $0x178] sm:$0xff] }
  0x32   : > { %1168 = vmatprep.subr.bf16.mxu0 %v1167_v15  ;;  %1227 = vmatprep.subr.bf16.mxu1 %v1360_v13  ;;  %v261_v15 = vlaneseq }
  0x33   : > { %1229 = vmatpush1.bf16.msra.mxu1 %v1228_v10  ;;  %v1120_v10 = vld [vmem:[%s1857_s3 + $0x170] sm:$0xff] }
  0x34   : > { %1066 = vmatmul.mubr.msk.f32.gmra.mrb[2].mxu0 %vm291_vm0, %v380_v21  ;;  %1230 = vmatprep.subr.bf16.mxu1 %v1360_v13  ;;  %v262_v16 = vshrl.u32 %v261_v15, 7  ;;  %v1249_v12 = vpack.c.bf16 %v1121_v11, %v1120_v10  ;;  %v1123_v15 = vld [vmem:[%s1857_s3 + $0x188] sm:$0xff] }
  0x35   : > { %1170 = vmatpush1.bf16.msra.mxu0 %v1169_v20  ;;  %578 = vmatprep.mubr.f32.mxu0 %v1359_v7 }
  0x36   : > { %1172 = vmatprep.subr.bf16.mxu0 %v1171_v22  ;;  %v263_v18 = vsub.s32 0, %v262_v16  ;;  %v267_v20 = vsub.s32 1, %v262_v16  ;;  %v605_v21 = vadd.s32 %v604_v17, %v262_v16  ;;  %v601_v22 = vadd.s32 8, %v262_v16 }
  0x37   : > { %1232 = vmatpush1.bf16.msra.mxu1 %v1231_v14  ;;  %v1122_v14 = vld [vmem:[%s1857_s3 + $0x180] sm:$0xff] }
  0x38   : > { %1233 = vmatprep.subr.bf16.mxu1 %v1360_v13  ;;  %v264_v23 = vrot.slane %v259_v19, %v263_v18  ;;  %v268_v24 = vrot.slane %v259_v19, %v267_v20  ;;  %vm607_vm1 = vcmp.ge.s32.totalorder %v605_v21, 0  ;;  %vm609_vm2 = vcmp.lt.s32.totalorder %v605_v21, 16  ;;  %v1125_v18 = vld [vmem:[%s1857_s3 + $0x198] sm:$0xff]  ;;  %v1126_v20 = vld [vmem:[%s1857_s3 + $0x1a0] sm:$0xff]  ;;  %v1127_v21 = vld [vmem:[%s1857_s3 + $0x1a8] sm:$0xff] }
  0x39   : > { %1174 = vmatpush1.bf16.msra.mxu0 %v1173_v27  ;;  %v606_v25 = vadd.s32 %v604_v17, %v601_v22  ;;  %vm1753_vm3 = vmand %vm607_vm1, %vm609_vm2  ;;  %v1252_v16 = vpack.c.bf16 %v1123_v15, %v1122_v14  ;;  %v1124_v17 = vld [vmem:[%s1857_s3 + $0x190] sm:$0xff] }
  0x3a   : > { %1176 = vmatprep.subr.bf16.mxu0 %v1175_v28  ;;  %v1255_v19 = vpack.c.bf16 %v1125_v18, %v1124_v17 }
  0x3b   : > { %vm608_vm4 = vcmp.ge.s32.totalorder %v606_v25, 0  ;;  %vm610_vm5 = vcmp.lt.s32.totalorder %v606_v25, 16 }
  0x3c   : > { %vm612_vm7 = vmand %vm608_vm4, %vm610_vm5 }
  0x3d   : > { %1178 = vmatpush1.bf16.msra.mxu0 %v1177_v31 }
  0x3e   : > { %530 = vmatprep.subr.mxu0 %v1084_v32 }
  0x41   : > { %531 = vmatpush1.msra.mxu0 %v1083_v35 }
  0x42   : > { %1085 = vmatmul.mubr.msk.f32.vlgmr.msra.gmra.mrb[0].mxu0 %vm291_vm0, %v487_v36  ;;  %1179 = vmatprep.subr.bf16.mxu0 %v1360_v13 }
  0x43   : > { %584 = vmatprep.mubr.f32.mxu0 %v1359_v7  ;;  %1181 = vmatpush1.bf16.msra.mxu0 %v1180_v37  ;;  %v642_v7 = vld [vmem:[%s1857_s3 + $0x30] sm:$0xff] }
  0x44   : > { %1182 = vmatprep.subr.bf16.mxu0 %v1360_v13  ;;  %v1189_v46 = vpack.c.bf16 %v643_v45, %v642_v7  ;;  %v1110_v7 = vld [vmem:[%s1857_s3 + $0x120] sm:$0xff]  ;;  %v1111_v45 = vld [vmem:[%s1857_s3 + $0x128] sm:$0xff] }
  0x45   : > { %v1234_v56 = vpack.c.bf16 %v1111_v45, %v1110_v7 }
  0x46   : > { %1086 = vmatmul.mubr.msk.f32.gmra.mrb[2].mxu0 %vm291_vm0, %v488_v40 }
  0x47   : > { %1184 = vmatpush1.bf16.msra.mxu0 %v1183_v41 }
  0x48   : > { %1185 = vmatprep.subr.bf16.mxu0 %v1360_v13 }
  0x4b   : > { %1187 = vmatpush1.bf16.msra.mxu0 %v1186_v44 }
  0x4c   : > { %1188 = vmatprep.subr.bf16.mxu0 %v1360_v13 }
  0x4f   : > { %1190 = vmatpush1.bf16.msra.mxu0 %v1189_v46 }
  0x50   : > { %1191 = vmatprep.subr.bf16.mxu0 %v1360_v13 }
  0x53   : > { %1193 = vmatpush1.bf16.msra.mxu0 %v1192_v49 }
  0x54   : > { %1194 = vmatprep.subr.bf16.mxu0 %v1360_v13 }
  0x57   : > { %1196 = vmatpush1.bf16.msra.mxu0 %v1195_v52 }
  0x58   : > { %1197 = vmatprep.subr.bf16.mxu0 %v1360_v13 }
  0x5b   : > { %1199 = vmatpush1.bf16.msra.mxu0 %v1198_v58 }
  0x5c   : > { %1200 = vmatprep.subr.bf16.mxu0 %v1360_v13 }
  0x5f   : > { %1202 = vmatpush1.bf16.msra.mxu0 %v1201_v0  ;;  %v1114_v0 = vld [vmem:[%s1857_s3 + $0x140] sm:$0xff] }
  0x60   : > { %1203 = vmatprep.subr.bf16.mxu0 %v1360_v13  ;;  %v1240_v2 = vpack.c.bf16 %v1115_v1, %v1114_v0 }
  0x63   : > { %1205 = vmatpush1.bf16.msra.mxu0 %v1204_v6  ;;  %v1118_v6 = vld [vmem:[%s1857_s3 + $0x160] sm:$0xff] }
  0x64   : > { %v1246_v9 = vpack.c.bf16 %v1119_v8, %v1118_v6 }
 0x115   : > { %v580_v26 = vpop.f32.mrb[0].mxu0 }
 0x116   : > { %v1260_v27 = vadd.f32 %v580_v26, %v264_v23  ;;  %v582_v28 = vpop.f32.mrb[1].mxu0 }
 0x117   : > { %v1261_v30 = vadd.f32 %v582_v28, %v268_v24 }
 0x118   : > { %v595_v31 = vmax.f32 %v1260_v27, 0.0 }
 0x119   : > { %v596_v32 = vmax.f32 %v1261_v30, 0.0  ;;  %v586_v33 = vpop.f32.mrb[2].mxu0  ;;  %v1089_v30 = vld [vmem:[%s1858_s4] ss:$0 sm:$0xff] }
 0x11a   : > { %v617_v34 = vsel %vm1753_vm3, %v595_v31, 0.0  ;;  %v1262_v35 = vadd.f32 %v586_v33, %v264_v23  ;;  %v588_v36 = vpop.f32.mrb[3].mxu0  ;;  %v1258_v23 = vpack.c.bf16 %v1127_v21, %v1126_v20 }
 0x11b   : > { %621 = vst [vmem:[#allocation2] sm:$0xff] %v617_v34  ;;  %v618_v37 = vsel %vm1753_vm3, %v596_v32, 0.0  ;;  %v1263_v38 = vadd.f32 %v588_v36, %v268_v24 }
 0x11c   : > { %v597_v39 = vmax.f32 %v1262_v35, 0.0  ;;  %623 = vst.msk [vmem:[#allocation2 + $0x8] sm:$0xff] %vm622_vm6, %v618_v37 }
 0x11d   : > { %v598_v40 = vmax.f32 %v1263_v38, 0.0 }
 0x11e   : > { %v619_v41 = vsel %vm612_vm7, %v597_v39, 0.0 }
 0x11f   : > { %624 = vst [vmem:[#allocation2 + $0x10] sm:$0x3] %v619_v41  ;;  %v620_v42 = vsel %vm612_vm7, %v598_v40, 0.0 }
 0x120   : > { %626 = vst.msk [vmem:[#allocation2 + $0x18] sm:$0x3] %vm625_vm8, %v620_v42 }
 0x122   : > { %v728_v46 = vld [vmem:[#allocation2] sm:$0xfe] }
 0x123   : > { %v635_v43 = vld [vmem:[#allocation2 + $0x8] sm:$0xff]  ;;  %v756_v55 = vrot.slane %v728_v46, 1  ;;  %v836_v24 = vld [vmem:[#allocation2] sm:$0xfc] }
 0x124   : > { %1090 = vmatprep.mubr.msk.f32.mxu0 %vm622_vm6, %v635_v43  ;;  %v729_v44 = vld [vmem:[#allocation2 + $0x8] sm:$0xfe]  ;;  %v864_v26 = vrot.slane %v836_v24, 2 }
 0x125   : > { %1318 = vmatmul.mubr.msk.f32.vlgmr.msra.gmra.mrb[4].mxu0 %vm1753_vm3, %v595_v31  ;;  %v837_v48 = vld [vmem:[#allocation2 + $0x8] sm:$0xfc]  ;;  %v759_v52 = vrot.slane %v729_v44, 1 }
 0x126   : > { %v730_v47 = vld [vmem:[#allocation2 + $0x10] sm:$0x1]  ;;  %v867_v58 = vrot.slane %v837_v48, 2 }
 0x127   : > { %v731_v49 = vld [vmem:[#allocation2 + $0x18] sm:$0x1]  ;;  %v757_v50 = vrot.slane %v730_v47, 1  ;;  %v838_v22 = vld [vmem:[#allocation2 + $0x10] sm:$0x3] }
 0x128   : > { %v839_v51 = vld [vmem:[#allocation2 + $0x18] sm:$0x3]  ;;  %v760_v53 = vrot.slane %v731_v49, 1  ;;  %v865_v25 = vrot.slane %v838_v22, 2 }
 0x129   : > { %v868_v54 = vrot.slane %v839_v51, 2  ;;  %v758_v61 = vsel %vm755_vm9, %v756_v55, %v757_v50 }
 0x12a   : > { %v761_v57 = vsel %vm755_vm9, %v759_v52, %v760_v53  ;;  %v866_v27 = vsel %vm863_vm10, %v864_v26, %v865_v25 }
 0x12b   : > { %1109 = vmatprep.mubr.msk.f32.mxu1 %vm622_vm6, %v761_v57  ;;  %v869_v62 = vsel %vm863_vm10, %v867_v58, %v868_v54 }
 0x12c   : > { %830 = vmatmul.mubr.f32.vlgmr.msra.gmra.mrb[0].mxu1 %v758_v61 }
 0x12d   : > { %1235 = vmatpush1.bf16.msra.mxu1 %v1234_v56  ;;  %1128 = vmatprep.mubr.msk.f32.mxu1 %vm622_vm6, %v869_v62 }
 0x12e   : > { %1236 = vmatprep.subr.bf16.mxu1 %v1360_v13 }
 0x131   : > { %1238 = vmatpush1.bf16.msra.mxu1 %v1237_v63 }
 0x132   : > { %1239 = vmatprep.subr.bf16.mxu1 %v1360_v13 }
 0x135   : > { %1241 = vmatpush1.bf16.msra.mxu1 %v1240_v2 }
 0x136   : > { %1242 = vmatprep.subr.bf16.mxu1 %v1360_v13 }
 0x139   : > { %1244 = vmatpush1.bf16.msra.mxu1 %v1243_v5 }
 0x13a   : > { %1245 = vmatprep.subr.bf16.mxu1 %v1360_v13 }
 0x13d   : > { %1247 = vmatpush1.bf16.msra.mxu1 %v1246_v9 }
 0x13e   : > { %1248 = vmatprep.subr.bf16.mxu1 %v1360_v13 }
 0x141   : > { %1250 = vmatpush1.bf16.msra.mxu1 %v1249_v12 }
 0x142   : > { %1251 = vmatprep.subr.bf16.mxu1 %v1360_v13 }
 0x145   : > { %1253 = vmatpush1.bf16.msra.mxu1 %v1252_v16 }
 0x146   : > { %1254 = vmatprep.subr.bf16.mxu1 %v1360_v13 }
 0x149   : > { %1256 = vmatpush1.bf16.msra.mxu1 %v1255_v19 }
 0x14a   : > { %1257 = vmatprep.subr.bf16.mxu1 %v1360_v13 }
 0x14d   : > { %1259 = vmatpush1.bf16.msra.mxu1 %v1258_v23 }
 0x150   : > { %938 = vmatmul.mubr.f32.vlgmr.msra.gmra.mrb[0].mxu1 %v866_v27 }
 0x1f8   : > { %v723_v28 = vpop.f32.mrb[4].mxu0 }
 0x1f9   : > { %v725_v29 = vpop.f32.mrb[5].mxu0  ;;  %v727_v31 = vadd.f32 %v1089_v30, %v723_v28 }
 0x223   : > { %v939_v32 = vpop.f32.mrb[0].mxu1 }
 0x224   : > { %v1265_v33 = vadd.f32 %v939_v32, %v727_v31  ;;  %v941_v13 = vpop.f32.mrb[1].mxu1 }
 0x226   : > { %v944_v34 = vmax.f32 %v1265_v33, 0.0 }
 0x228   : > { %945 = vst [vmem:[%s258_s15] sm:$0xff] %v944_v34 }
 0x229 PF: > { %s15_s22 = sadd.s32 1, %s1357_s22   ;;  %s1862_s18 = smov %s1349_s20 }
 0x22a   : > { %p12_p7 = scmp.ge.s32.totalorder %s15_s22, 6   ;;  %s1863_s19 = smov %s1353_s21 }
 0x22b   : > { %s1864_s20 = smov %s1867_s23  ;;  %s1865_s21 = smov %s1871_s24 }
 0x22c   :  { %14 = sbr.rel (!%p12_p7) target bundleno = 3 (0x3), region = 74 }

</bundles_post_ra>
